<compile_context>
chip_gen: v5e
topology: v5e:2x2
jax: 0.10.0
libtpu: 0.0.40
codegen_flags: <defaults>
</compile_context>

<pallas_src>
import functools

import jax
import jax.numpy as jnp
from jax.experimental import pallas as pl
from jax.experimental.pallas import tpu as pltpu

LANES = 128
MAX_BLOCK_ROWS = 2048   # 2048 * 128 * 4B = 1 MiB per f32 input per buffer
ACC_ROWS = 8            # vreg-shaped partial-sum accumulator (8, 128)


def _round_up(a, b):
    return ((a + b - 1) // b) * b


def _stable_bce(x, z):
    # Numerically stable BCE-with-logits: max(x,0) - x*z + log1p(exp(-|x|))
    return jnp.maximum(x, 0.0) - x * z + jnp.log1p(jnp.exp(-jnp.abs(x)))


def _tile_loss(x_ref, t_ref, w_ref, *, block_rows, n_seq, total_rows, need_mask):
    x = x_ref[...].astype(jnp.float32)
    z = t_ref[...].astype(jnp.float32)
    loss = _stable_bce(x, z)
    if w_ref is not None:
        loss = loss * w_ref[...].astype(jnp.float32)
    if need_mask:
        # Ragged last block: rows past the end of the array hold undefined
        # (padded) data -> select them to zero before accumulating.
        row0 = (pl.program_id(0) * n_seq + pl.program_id(1)) * block_rows
        rid = row0 + jax.lax.broadcasted_iota(jnp.int32, loss.shape, 0)
        loss = jnp.where(rid < total_rows, loss, 0.0)
    return loss


def _accumulate(o_ref, loss):
    @pl.when(pl.program_id(1) == 0)
    def _():
        o_ref[...] = jnp.zeros_like(o_ref)
    # VPU-only partial reduction: (block_rows, 128) -> (8, 128) accumulator.
    o_ref[...] += jnp.sum(loss.reshape(-1, ACC_ROWS, LANES), axis=0)


def _bce_kernel_weighted(x_ref, t_ref, w_ref, o_ref, *, block_rows, n_seq,
                         total_rows, need_mask):
    loss = _tile_loss(x_ref, t_ref, w_ref, block_rows=block_rows, n_seq=n_seq,
                      total_rows=total_rows, need_mask=need_mask)
    _accumulate(o_ref, loss)


def _bce_kernel_unweighted(x_ref, t_ref, o_ref, *, block_rows, n_seq,
                           total_rows, need_mask):
    loss = _tile_loss(x_ref, t_ref, None, block_rows=block_rows, n_seq=n_seq,
                      total_rows=total_rows, need_mask=need_mask)
    _accumulate(o_ref, loss)


def bce_weighted_loss(inputs, target, weight=None):
    """Matches F.binary_cross_entropy_with_logits(input, target, weight,
    size_average=True): mean over all elements of weight * per-element loss."""
    assert inputs.shape == target.shape
    total_n = int(inputs.size)
    if weight is not None:
        weight = jnp.broadcast_to(weight, inputs.shape)

    x_flat = inputs.reshape(-1)
    t_flat = target.reshape(-1)
    w_flat = weight.reshape(-1) if weight is not None else None

    main_n = (total_n // LANES) * LANES
    tail_n = total_n - main_n

    total_sum = jnp.float32(0.0)

    if main_n > 0:
        rows = main_n // LANES

        def to2d(a):
            a = a if tail_n == 0 else a[:main_n]
            return a.reshape(rows, LANES)

        operands = [to2d(x_flat), to2d(t_flat)]
        if w_flat is not None:
            operands.append(to2d(w_flat))

        # Block rows: multiple of 16 (bf16 min tile), capped at ~1 MiB f32.
        block_rows = min(MAX_BLOCK_ROWS, _round_up(rows, 16))
        num_tiles = pl.cdiv(rows, block_rows)
        # Shard the reduction across both TensorCores (v7x) when it splits
        # evenly; otherwise run a single sequential reduction.
        n_par = 2 if (num_tiles >= 2 and num_tiles % 2 == 0) else 1
        n_seq = num_tiles // n_par
        need_mask = (num_tiles * block_rows != rows)

        in_spec = pl.BlockSpec((block_rows, LANES),
                               lambda c, i: (c * n_seq + i, 0))
        out_spec = pl.BlockSpec((None, ACC_ROWS, LANES),
                                lambda c, i: (c, 0, 0))

        kernel = _bce_kernel_weighted if w_flat is not None else _bce_kernel_unweighted
        partials = pl.pallas_call(
            functools.partial(kernel, block_rows=block_rows, n_seq=n_seq,
                              total_rows=rows, need_mask=need_mask),
            out_shape=jax.ShapeDtypeStruct((n_par, ACC_ROWS, LANES), jnp.float32),
            grid=(n_par, n_seq),
            in_specs=[in_spec] * len(operands),
            out_specs=out_spec,
            compiler_params=pltpu.CompilerParams(
                dimension_semantics=("parallel", "arbitrary")),
        )(*operands)
        total_sum = total_sum + jnp.sum(partials)

    if tail_n > 0:
        # Sub-128-element tail: negligible, handled in plain JAX.
        xt = x_flat[main_n:].astype(jnp.float32)
        zt = t_flat[main_n:].astype(jnp.float32)
        lt = _stable_bce(xt, zt)
        if w_flat is not None:
            lt = lt * w_flat[main_n:].astype(jnp.float32)
        total_sum = total_sum + jnp.sum(lt)

    return total_sum / jnp.float32(total_n)


def _reference(inputs, target, weight=None):
    x = inputs.astype(jnp.float32)
    z = target.astype(jnp.float32)
    loss = _stable_bce(x, z)
    if weight is not None:
        loss = loss * jnp.broadcast_to(weight, loss.shape).astype(jnp.float32)
    return jnp.mean(loss)


if __name__ == "__main__":
    key = jax.random.PRNGKey(0)
    k1, k2, k3 = jax.random.split(key, 3)

    # SiamFC-style response map: (B, C, H, W)
    B, C, H, W = 2, 4, 16, 16
    logits = jax.random.normal(k1, (B, C, H, W), dtype=jnp.float32) * 2.0
    target = (jax.random.uniform(k2, (B, C, H, W)) > 0.5).astype(jnp.float32)
    weight = jax.random.uniform(k3, (B, C, H, W), dtype=jnp.float32)

    # Weighted path
    out = jax.block_until_ready(bce_weighted_loss(logits, target, weight))
    ref = _reference(logits, target, weight)
    assert jnp.allclose(out, ref, rtol=1e-5, atol=1e-5), (out, ref)

    # weight=None path (2-input kernel variant, no ones() stream)
    out_nw = jax.block_until_ready(bce_weighted_loss(logits, target, None))
    ref_nw = _reference(logits, target, None)
    assert jnp.allclose(out_nw, ref_nw, rtol=1e-5, atol=1e-5), (out_nw, ref_nw)

    print("KERNEL_OK")
</pallas_src>

<mosaic_0001>
module attributes {stable_mosaic.version = 11 : i64} {
  func.func @_bce_kernel_weighted(%arg0: i32, %arg1: i32, %arg2: memref<16x128xf32, #tpu.memory_space<vmem>>, %arg3: memref<16x128xf32, #tpu.memory_space<vmem>>, %arg4: memref<16x128xf32, #tpu.memory_space<vmem>>, %arg5: memref<1x8x128xf32, #tpu.memory_space<vmem>>) attributes {dimension_semantics = [#tpu.dimension_semantics<parallel>, #tpu.dimension_semantics<arbitrary>], iteration_bounds = array<i64: 1, 1>, scalar_prefetch = 0 : i64, scratch_operands = 0 : i64, tpu.core_type = #tpu.core_type<tc>, window_params = [{transform_indices = @transform_0, window_bounds = array<i64: 16, 128>}, {transform_indices = @transform_1, window_bounds = array<i64: 16, 128>}, {transform_indices = @transform_2, window_bounds = array<i64: 16, 128>}, {transform_indices = @transform_3, window_bounds = array<i64: 1, 8, 128>}]} {
    %c0 = arith.constant 0 : index
    %c0_0 = arith.constant 0 : index
    %0 = vector.load %arg2[%c0, %c0_0] : memref<16x128xf32, #tpu.memory_space<vmem>>, vector<16x128xf32>
    %c0_1 = arith.constant 0 : index
    %c0_2 = arith.constant 0 : index
    %1 = vector.load %arg3[%c0_1, %c0_2] : memref<16x128xf32, #tpu.memory_space<vmem>>, vector<16x128xf32>
    %cst = arith.constant 0.000000e+00 : f32
    %2 = vector.broadcast %cst : f32 to vector<16x128xf32>
    %3 = arith.maximumf %0, %2 : vector<16x128xf32>
    %4 = arith.mulf %0, %1 : vector<16x128xf32>
    %5 = arith.subf %3, %4 : vector<16x128xf32>
    %6 = math.absf %0 : vector<16x128xf32>
    %cst_3 = arith.constant 0.000000e+00 : f32
    %7 = vector.broadcast %cst_3 : f32 to vector<16x128xf32>
    %8 = arith.subf %7, %6 : vector<16x128xf32>
    %9 = math.exp %8 : vector<16x128xf32>
    %10 = math.log1p %9 : vector<16x128xf32>
    %11 = arith.addf %5, %10 : vector<16x128xf32>
    %c0_4 = arith.constant 0 : index
    %c0_5 = arith.constant 0 : index
    %12 = vector.load %arg4[%c0_4, %c0_5] : memref<16x128xf32, #tpu.memory_space<vmem>>, vector<16x128xf32>
    %13 = arith.mulf %11, %12 : vector<16x128xf32>
    %c0_i32 = arith.constant 0 : i32
    %14 = arith.cmpi eq, %arg1, %c0_i32 : i32
    %15 = arith.extui %14 : i1 to i32
    %c0_i32_6 = arith.constant 0 : i32
    %16 = arith.cmpi ne, %15, %c0_i32_6 : i32
    scf.if %16 {
      %cst_14 = arith.constant 0.000000e+00 : f32
      %25 = vector.broadcast %cst_14 : f32 to vector<8x128xf32>
      %c0_15 = arith.constant 0 : index
      %c0_16 = arith.constant 0 : index
      %c0_17 = arith.constant 0 : index
      %26 = vector.load %arg5[%c0_15, %c0_16, %c0_17] : memref<1x8x128xf32, #tpu.memory_space<vmem>>, vector<1x8x128xf32>
      %27 = vector.shape_cast %26 : vector<1x8x128xf32> to vector<8x128xf32>
      %28 = vector.shape_cast %25 : vector<8x128xf32> to vector<1x8x128xf32>
      tpu.vector_store %arg5[%c0_15, %c0_16, %c0_17], %28 {strides = array<i32>} : memref<1x8x128xf32, #tpu.memory_space<vmem>>, vector<1x8x128xf32>,
    } else {
    }
    %c0_7 = arith.constant 0 : index
    %c0_8 = arith.constant 0 : index
    %c0_9 = arith.constant 0 : index
    %17 = vector.load %arg5[%c0_7, %c0_8, %c0_9] : memref<1x8x128xf32, #tpu.memory_space<vmem>>, vector<1x8x128xf32>
    %18 = vector.shape_cast %17 : vector<1x8x128xf32> to vector<8x128xf32>
    %19 = vector.shape_cast %13 : vector<16x128xf32> to vector<2x8x128xf32>
    %cst_10 = arith.constant dense<0.000000e+00> : vector<8x128xf32>
    %20 = vector.multi_reduction <add>, %19, %cst_10 [0] : vector<2x8x128xf32> to vector<8x128xf32>
    %21 = arith.addf %18, %20 : vector<8x128xf32>
    %c0_11 = arith.constant 0 : index
    %c0_12 = arith.constant 0 : index
    %c0_13 = arith.constant 0 : index
    %22 = vector.load %arg5[%c0_11, %c0_12, %c0_13] : memref<1x8x128xf32, #tpu.memory_space<vmem>>, vector<1x8x128xf32>
    %23 = vector.shape_cast %22 : vector<1x8x128xf32> to vector<8x128xf32>
    %24 = vector.shape_cast %21 : vector<8x128xf32> to vector<1x8x128xf32>
    tpu.vector_store %arg5[%c0_11, %c0_12, %c0_13], %24 {strides = array<i32>} : memref<1x8x128xf32, #tpu.memory_space<vmem>>, vector<1x8x128xf32>,
    return
  }
  func.func @transform_0(%arg0: i32, %arg1: i32) -> (i32, i32) {
    %c1_i32 = arith.constant 1 : i32
    %0 = arith.muli %arg0, %c1_i32 : i32
    %1 = arith.addi %0, %arg1 : i32
    %c0_i32 = arith.constant 0 : i32
    %c0_i32_0 = arith.constant 0 : i32
    return %1, %c0_i32 : i32, i32
  }
  func.func @transform_1(%arg0: i32, %arg1: i32) -> (i32, i32) {
    %c1_i32 = arith.constant 1 : i32
    %0 = arith.muli %arg0, %c1_i32 : i32
    %1 = arith.addi %0, %arg1 : i32
    %c0_i32 = arith.constant 0 : i32
    %c0_i32_0 = arith.constant 0 : i32
    return %1, %c0_i32 : i32, i32
  }
  func.func @transform_2(%arg0: i32, %arg1: i32) -> (i32, i32) {
    %c1_i32 = arith.constant 1 : i32
    %0 = arith.muli %arg0, %c1_i32 : i32
    %1 = arith.addi %0, %arg1 : i32
    %c0_i32 = arith.constant 0 : i32
    %c0_i32_0 = arith.constant 0 : i32
    return %1, %c0_i32 : i32, i32
  }
  func.func @transform_3(%arg0: i32, %arg1: i32) -> (i32, i32, i32) {
    %c0_i32 = arith.constant 0 : i32
    %c0_i32_0 = arith.constant 0 : i32
    %c0_i32_1 = arith.constant 0 : i32
    return %arg0, %c0_i32, %c0_i32_0 : i32, i32, i32
  }
}

</mosaic_0001>

<bundles_post_ra>
// kernel: tpu_custom_call.1
= control target key start
LH: loop header
LB: loop body
LE: loop exit
PB: predicated region body
PF: predicated region fallthrough
CT: control target
= control target key end

     0   :  { %8 = vsyncpa [#allocation3], 0  ;;  %s304_s0 = inlined_call_operand.hbm [shape: f32[16,128], index: 0, kind: input, shape index: {}]   ;;  %s305_s1 = inlined_call_operand.hbm [shape: f32[16,128], index: 1, kind: input, shape index: {}]   ;;  %s306_s2 = inlined_call_operand.hbm [shape: f32[16,128], index: 2, kind: input, shape index: {}]   ;;  %s307_s3 = inlined_call_operand.hbm [shape: f32[1,8,128], index: 3, kind: output, shape index: {}]  }
   0x1   :  { %9 = vsyncpa [#allocation6], 0 }
   0x2   :  { %10 = vsyncpa [#allocation4], 0  ;;  %s36_s14 = sshll.u32 %s305_s1, 4  ;;  %s266_s15 = smov [#allocation5]   ;;  %s37_s14 = int_to_ptr.hbm [resolvable:$true] %s36_s14 }
   0x3   :  { %s38_s16 = sshll.u32 %s266_s15, 4  ;;  %s19_s19 = sshll.u32 %s304_s0, 4  ;;  %s39_s16 = int_to_ptr.vmem [resolvable:$true] %s38_s16  ;;  %s20_s19 = int_to_ptr.hbm [resolvable:$true] %s19_s19 }
   0x4   :  { %s267_s20 = smov 128   ;;  %s268_s21 = smov 8  }
   0x5   :  { %44 = dma.hbm_to_vmem [thread:$0]  %s37_s14, 256, %s39_s16, [#allocation6], %s267_s20, %s267_s20, %s268_s21  }
   0x6   :  { %s269_s22 = smov [#allocation2]   ;;  %s53_s26 = sshll.u32 %s306_s2, 4  ;;  %s54_s26 = int_to_ptr.hbm [resolvable:$true] %s53_s26 }
   0x7   :  { %s21_s23 = sshll.u32 %s269_s22, 4  ;;  %s270_s1 = smov [#allocation7]   ;;  %s22_s23 = int_to_ptr.vmem [resolvable:$true] %s21_s23 }
   0x8   :  { %27 = dma.hbm_to_vmem [thread:$0]  %s20_s19, 256, %s22_s23, [#allocation3], %s267_s20, %s267_s20, %s268_s21  }
   0x9   :  { %s55_s27 = sshll.u32 %s270_s1, 4  ;;  %s56_s27 = int_to_ptr.vmem [resolvable:$true] %s55_s27 }
   0xa   :  { %61 = dma.hbm_to_vmem [thread:$0]  %s54_s26, 256, %s56_s27, [#allocation6], %s267_s20, %s267_s20, %s268_s21  }
   0xb   :  { %260 = dma.done.wait [#allocation3], 256  }
   0xc   :  { %261 = vsyncadd [#allocation3], 4294967040 }
   0xd   :  { %262 = dma.done.wait [#allocation6], 512  }
   0xe   :  { %263 = vsyncadd [#allocation6], 4294966784  ;;  %v80_v0 = vld [vmem:[#allocation2] sm:$0xff]  ;;  %v81_v1 = vld [vmem:[#allocation2 + $0x8] sm:$0xff]  ;;  %s271_s0 = smov [#allocation8]   ;;  %s138_s30 = sshll.u32 %s307_s3, 4  ;;  %s139_s30 = int_to_ptr.hbm [resolvable:$true] %s138_s30 }
   0xf   :  { %v90_v2 = vand.u32 2147483647, %v80_v0  ;;  %v91_v3 = vand.u32 2147483647, %v81_v1  ;;  %v82_v12 = vld [vmem:[#allocation5] sm:$0xff]  ;;  %v83_v15 = vld [vmem:[#allocation5 + $0x8] sm:$0xff] }
  0x10   :  { %v84_v17 = vmax.f32 %v80_v0, 0.0  ;;  %v86_v18 = vmul.f32 %v82_v12, %v80_v0  ;;  %v85_v21 = vmax.f32 %v81_v1, 0.0  ;;  %v87_v22 = vmul.f32 %v83_v15, %v81_v1  ;;  %v118_v33 = vld [vmem:[#allocation7] sm:$0xff]  ;;  %v119_v36 = vld [vmem:[#allocation7 + $0x8] sm:$0xff]  ;;  %s136_s2 = sshll.u32 %s271_s0, 4  ;;  %s137_s2 = int_to_ptr.vmem [resolvable:$true] %s136_s2 }
  0x11   :  { %v92_v4 = vsub.f32 0.0, %v90_v2  ;;  %v93_v5 = vsub.f32 0.0, %v91_v3 }
  0x12   :  { %v88_v26 = vsub.f32 %v84_v17, %v86_v18  ;;  %v89_v29 = vsub.f32 %v85_v21, %v87_v22 }
  0x13   :  { %v94_v6 = vmul.f32 1.442695, %v92_v4  ;;  %v96_v7 = vmul.f32 1.442695, %v93_v5 }
  0x15   :  { %156 = vpow2.f32 %v94_v6 }
  0x16   :  { %158 = vpow2.f32 %v96_v7 }
  0x1b   :  { %v157_v8 = vpop.eup %156 }
  0x1c   :  { %v159_v9 = vpop.eup %158  ;;  %v98_v10 = vadd.f32 1.0, %v157_v8  ;;  %v101_v11 = vmul.f32 -0.5, %v157_v8  ;;  %v104_v19 = vand.u32 2147483647, %v157_v8 }
  0x1d   :  { %v107_v13 = vadd.f32 1.0, %v159_v9  ;;  %v110_v14 = vmul.f32 -0.5, %v159_v9  ;;  %v113_v23 = vand.u32 2147483647, %v159_v9 }
  0x1e   :  { %160 = vlog2.f32 %v98_v10  ;;  %v102_v16 = vadd.f32 1.0, %v101_v11  ;;  %vm105_vm0 = vcmp.lt.f32.partialorder %v104_v19, 0.0004427343 }
  0x1f   :  { %162 = vlog2.f32 %v107_v13  ;;  %v111_v20 = vadd.f32 1.0, %v110_v14  ;;  %vm114_vm1 = vcmp.lt.f32.partialorder %v113_v23, 0.0004427343 }
  0x20   :  { %v103_v24 = vmul.f32 %v157_v8, %v102_v16 }
  0x21   :  { %v112_v27 = vmul.f32 %v159_v9, %v111_v20 }
  0x24   :  { %v161_v25 = vpop.eup %160 }
  0x25   :  { %v163_v28 = vpop.eup %162  ;;  %v100_v30 = vmul.f32 0.6931472, %v161_v25 }
  0x26   :  { %v109_v31 = vmul.f32 0.6931472, %v163_v28 }
  0x27   :  { %v106_v32 = vsel %vm105_vm0, %v103_v24, %v100_v30 }
  0x28   :  { %v115_v34 = vsel %vm114_vm1, %v112_v27, %v109_v31  ;;  %v116_v35 = vadd.f32 %v106_v32, %v88_v26 }
  0x29   :  { %v117_v37 = vadd.f32 %v115_v34, %v89_v29 }
  0x2a   :  { %v120_v38 = vmul.f32 %v118_v33, %v116_v35 }
  0x2b   :  { %v121_v39 = vmul.f32 %v119_v36, %v117_v37 }
  0x2d   :  { %v128_v40 = vadd.f32 %v121_v39, %v120_v38 }
  0x2f   :  { %130 = vst [vmem:[#allocation8] sm:$0xff] %v128_v40 }
  0x30   :  { %141 = dma.vmem_to_hbm [thread:$0]  %s137_s2, 128, %s139_s30, [#allocation4]  }
  0x31   :  { %264 = dma.done.wait [#allocation4], 128  }
  0x32   :  { %265 = vsyncadd [#allocation4], 4294967168 }
  0x33   :  { %146 = vsyncpa [#allocation3], 1 }
  0x34   :  { %147 = vsyncpa [#allocation6], 1 }
  0x35   :  { %148 = vsyncpa [#allocation4], 1 }

</bundles_post_ra>
